<compile_context>
chip_gen: v7x
topology: tpu7x:2x2x1
jax: 0.10.0
libtpu: 0.0.40
codegen_flags: <defaults>
</compile_context>

<pallas_src>
import functools

import jax
import jax.numpy as jnp
from jax.experimental import pallas as pl
from jax.experimental.pallas import tpu as pltpu

LN_EPS = 1e-5  # torch.nn.LayerNorm default


def gc_block_kernel(x_ref, pk_ref, w1_ref, w2_ref, o_ref, *, n_cr, hw_valid):
    # x_ref : (bt, C, HWp) activations; HW on the lane (fast) axis, C on sublanes
    # pk_ref: (5, C) packed params: row0=wm  row1=b2  row2[:Cr]=b1
    #                               row3[:Cr]=gamma  row4[:Cr]=beta
    # w1_ref: (Cr, C) channel_add_conv[0] weight;  w2_ref: (C, Cr) conv[3] weight
    bt, n_ch, hw_pad = x_ref.shape

    x = x_ref[...]                                      # (bt, C, HWp) f32
    pk = pk_ref[...]                                    # (5, C)
    wm = pk[0:1, :]                                     # (1, C)   conv_mask weight
    b2 = pk[1:2, :].reshape(1, 1, n_ch)                 # (1, 1, C)
    b1 = pk[2:3, 0:n_cr].reshape(1, 1, n_cr)            # (1, 1, Cr)
    gam = pk[3:4, 0:n_cr].reshape(1, 1, n_cr)           # LayerNorm weight
    bet = pk[4:5, 0:n_cr].reshape(1, 1, n_cr)           # LayerNorm bias

    # ---- spatial_pool (attention pooling), batched over bt ----
    # conv_mask 1x1 (C -> 1) as a batched matvec on the MXU: (bt,1,C)@(bt,C,HWp).
    wm_b = jnp.broadcast_to(wm.reshape(1, 1, n_ch), (bt, 1, n_ch))
    logits = jnp.einsum("boc,bcs->bos", wm_b, x,
                        preferred_element_type=jnp.float32)       # (bt, 1, HWp)
    # conv_mask bias folded out exactly: softmax over HW is shift-invariant.
    if hw_valid < hw_pad:  # static; only when H*W % 128 != 0
        lane = jax.lax.broadcasted_iota(jnp.int32, (1, 1, hw_pad), 2)
        logits = jnp.where(lane < hw_valid, logits, jnp.float32(-1e30))
    m = jnp.max(logits, axis=-1, keepdims=True)
    e = jnp.exp(logits - m)
    denom = jnp.sum(e, axis=-1, keepdims=True)
    attn = e * (1.0 / denom)                            # exact reciprocal (review fix)
    # context: lane contraction routed through the MXU (flash-attention pattern).
    ctx = jnp.einsum("bos,bcs->boc", attn, x,
                     preferred_element_type=jnp.float32)          # (bt, 1, C)

    # ---- channel_add_conv, batched over bt:
    #      1x1 conv -> LayerNorm([Cr,1,1]) -> ReLU -> 1x1 conv ----
    w1_b = jnp.broadcast_to(w1_ref[...].reshape(1, n_cr, n_ch), (bt, n_cr, n_ch))
    w2_b = jnp.broadcast_to(w2_ref[...].reshape(1, n_ch, n_cr), (bt, n_ch, n_cr))
    t = jnp.einsum("boc,brc->bor", ctx, w1_b,
                   preferred_element_type=jnp.float32) + b1        # (bt, 1, Cr)
    mu = jnp.mean(t, axis=-1, keepdims=True)
    var = jnp.mean(jnp.square(t - mu), axis=-1, keepdims=True)
    tn = (t - mu) * jax.lax.rsqrt(var + LN_EPS)
    tn = tn * gam + bet
    tn = jnp.maximum(tn, 0.0)                                      # ReLU
    add = jnp.einsum("bor,bcr->boc", tn, w2_b,
                     preferred_element_type=jnp.float32) + b2      # (bt, 1, C)

    # ---- fusion: out = x + channel_add_term (broadcast over HW) ----
    add_col = jnp.swapaxes(add, 1, 2)                              # (bt, C, 1)
    o_ref[...] = (x + add_col).astype(o_ref.dtype)


def wmsp_context_block(x_nchw, params, *, max_bt=16):
    """x_nchw: (B, C, H, W) float32. params: dict of module weights.

    Call under jax.jit (the in-place input/output aliasing relies on XLA
    buffer assignment to insert copies if the input cannot be clobbered).
    """
    B, C, H, W = x_nchw.shape
    HW = H * W
    Cr = params["w1"].shape[0]

    # Lane-dense spatial axis (multiple of 128) -> unmasked vector stores.
    HWp = ((HW + 127) // 128) * 128
    x = x_nchw.reshape(B, C, HW)
    if HWp != HW:
        x = jnp.pad(x, ((0, 0), (0, 0), (0, HWp - HW)))

    # --- chip-aware VMEM sizing (v7x has only 64 MiB/TC; v5e/v6e have 128) ---
    try:
        vmem_cap = int(pltpu.get_tpu_info().vmem_capacity_bytes)
    except Exception:
        vmem_cap = 64 * 1024 * 1024  # conservative default works on every gen
    usable = max(vmem_cap - 16 * 1024 * 1024, 16 * 1024 * 1024)
    # Pipelined footprint budget: x and out blocks are each double-buffered.
    pipeline_budget = min(int(0.6 * usable), 48 * 1024 * 1024)

    per_batch_bytes = C * HWp * 4
    bt = max(1, min(B, max_bt, pipeline_budget // (4 * per_batch_bytes)))
    if B >= 2:
        # Guarantee >= 2 grid steps so the "parallel" axis shards across the
        # two TensorCores on v7x; ~one extra 0.35us step on 1-TC chips.
        bt = min(bt, max(1, B // 2))
    b_pad = ((B + bt - 1) // bt) * bt
    if b_pad != B:
        x = jnp.pad(x, ((0, b_pad - B), (0, 0), (0, 0)))

    # Pack the six tiny per-channel vectors into one (5, C) array (one DMA).
    pk = jnp.zeros((5, C), jnp.float32)
    pk = pk.at[0, :].set(params["wm"][:, 0])
    pk = pk.at[1, :].set(params["b2"][:, 0])
    pk = pk.at[2, :Cr].set(params["b1"][:, 0])
    pk = pk.at[3, :Cr].set(params["gamma"][:, 0])
    pk = pk.at[4, :Cr].set(params["beta"][:, 0])
    # params["bm"] (conv_mask bias) intentionally unused: softmax(l+c) == softmax(l).

    param_bytes = (5 * C + 2 * Cr * C) * 4
    need = 4 * bt * per_batch_bytes + 2 * param_bytes + 4 * 1024 * 1024
    vmem_limit = int(min(max(need, 16 * 1024 * 1024), usable))

    cost = pl.CostEstimate(
        flops=int(b_pad * (5 * C * HWp + 6 * HWp + 4 * Cr * C + 16 * Cr)),
        transcendentals=int(b_pad * HWp),
        bytes_accessed=int(2 * b_pad * C * HWp * 4 + (5 * C + 2 * Cr * C) * 4),
    )

    kernel = functools.partial(gc_block_kernel, n_cr=Cr, hw_valid=HW)

    out = pl.pallas_call(
        kernel,
        out_shape=jax.ShapeDtypeStruct((b_pad, C, HWp), x.dtype),
        grid_spec=pltpu.PrefetchScalarGridSpec(
            num_scalar_prefetch=0,
            grid=(b_pad // bt,),
            in_specs=[
                pl.BlockSpec((bt, C, HWp), lambda i: (i, 0, 0)),   # x (aliased to out)
                pl.BlockSpec((5, C), lambda i: (0, 0)),            # packed vectors
                pl.BlockSpec((Cr, C), lambda i: (0, 0)),           # conv1 weight
                pl.BlockSpec((C, Cr), lambda i: (0, 0)),           # conv2 weight
            ],
            out_specs=pl.BlockSpec((bt, C, HWp), lambda i: (i, 0, 0)),
        ),
        compiler_params=pltpu.CompilerParams(
            dimension_semantics=("parallel",),
            vmem_limit_bytes=vmem_limit,
        ),
        cost_estimate=cost,
        input_output_aliases={0: 0},   # write out = x + add in place (no 2nd HBM buf)
    )(x, pk, params["w1"], params["w2"])

    out = out[:B, :, :HW]
    return out.reshape(B, C, H, W)


def reference_jax(x_nchw, params):
    """Pure-JAX reference mirroring the PyTorch forward (includes conv_mask bias).

    Implemented with broadcast-multiply-sum reductions (no XLA dots) so it is
    exact f32 regardless of the backend's default matmul precision.
    """
    B, C, H, W = x_nchw.shape
    x = x_nchw.reshape(B, C, H * W)
    wm = params["wm"][:, 0]
    logits = jnp.sum(x * wm[None, :, None], axis=1) + params["bm"][0, 0]   # (B, HW)
    attn = jax.nn.softmax(logits, axis=-1)
    ctx = jnp.sum(x * attn[:, None, :], axis=2)                            # (B, C)
    t = jnp.sum(ctx[:, None, :] * params["w1"][None, :, :], axis=2) + params["b1"][:, 0]
    mu = jnp.mean(t, axis=-1, keepdims=True)
    var = jnp.mean((t - mu) ** 2, axis=-1, keepdims=True)
    tn = (t - mu) / jnp.sqrt(var + LN_EPS)
    tn = tn * params["gamma"][:, 0] + params["beta"][:, 0]
    tn = jnp.maximum(tn, 0.0)
    add = jnp.sum(tn[:, None, :] * params["w2"][None, :, :], axis=2) + params["b2"][:, 0]
    return x_nchw + add[:, :, None, None]


if __name__ == "__main__":
    # Module config: inplanes = planes = 32, ratio = 8 -> bottleneck Cr = 4.
    # (scale, gc_w are stored by the module but unused in forward.)
    B, C, H, W = 2, 32, 16, 16
    ratio = 8
    Cr = C // ratio

    key = jax.random.PRNGKey(0)
    ks = jax.random.split(key, 8)
    params = {
        # conv_mask: Conv2d(C, 1, 1) -> weight (1,C,1,1), bias (1,)
        "wm": jax.random.normal(ks[0], (C, 1), jnp.float32) * 0.1,
        "bm": jax.random.normal(ks[1], (1, 1), jnp.float32) * 0.1,
        # channel_add_conv[0]: Conv2d(C, Cr, 1)
        "w1": jax.random.normal(ks[2], (Cr, C), jnp.float32) * 0.1,
        "b1": jax.random.normal(ks[3], (Cr, 1), jnp.float32) * 0.1,
        # LayerNorm([Cr,1,1]) default init (weight=1, bias=0)
        "gamma": jnp.ones((Cr, 1), jnp.float32),
        "beta": jnp.zeros((Cr, 1), jnp.float32),
        # channel_add_conv[3]: Conv2d(Cr, C, 1)
        "w2": jax.random.normal(ks[4], (C, Cr), jnp.float32) * 0.1,
        "b2": jax.random.normal(ks[5], (C, 1), jnp.float32) * 0.1,
    }

    x = jax.random.normal(ks[6], (B, C, H, W), jnp.float32)

    out = jax.jit(wmsp_context_block)(x, params)
    out = jax.block_until_ready(out)

    ref = reference_jax(x, params)
    assert out.shape == (B, C, H, W)
    err = float(jnp.max(jnp.abs(out - ref)))
    # Kernel math is exact (no approximate reciprocal); the tolerance only
    # covers MXU accumulation-order differences vs. the pure-VPU reference.
    assert jnp.allclose(out, ref, atol=5e-4, rtol=5e-4), (
        f"mismatch vs reference (max abs err {err:.3e})")

    print("KERNEL_OK")
</pallas_src>

<mosaic_0001>
module attributes {stable_mosaic.version = 11 : i64} {
  func.func @gc_block_kernel(%arg0: i32, %arg1: memref<1x32x256xf32, #tpu.memory_space<vmem>>, %arg2: memref<5x32xf32, #tpu.memory_space<vmem>>, %arg3: memref<4x32xf32, #tpu.memory_space<vmem>>, %arg4: memref<32x4xf32, #tpu.memory_space<vmem>>, %arg5: memref<1x32x256xf32, #tpu.memory_space<vmem>>) attributes {dimension_semantics = [#tpu.dimension_semantics<parallel>], iteration_bounds = array<i64: 2>, scalar_prefetch = 0 : i64, scratch_operands = 0 : i64, tpu.core_type = #tpu.core_type<tc>, window_params = [{transform_indices = @transform_0, window_bounds = array<i64: 1, 32, 256>}, {pipeline_mode = #tpu.pipeline_mode<synchronous>, transform_indices = @transform_1, window_bounds = array<i64: 5, 32>}, {pipeline_mode = #tpu.pipeline_mode<synchronous>, transform_indices = @transform_2, window_bounds = array<i64: 4, 32>}, {pipeline_mode = #tpu.pipeline_mode<synchronous>, transform_indices = @transform_3, window_bounds = array<i64: 32, 4>}, {transform_indices = @transform_4, window_bounds = array<i64: 1, 32, 256>}]} {
    %c0 = arith.constant 0 : index
    %c0_0 = arith.constant 0 : index
    %c0_1 = arith.constant 0 : index
    %0 = vector.load %arg1[%c0, %c0_0, %c0_1] : memref<1x32x256xf32, #tpu.memory_space<vmem>>, vector<1x32x256xf32>
    %c0_2 = arith.constant 0 : index
    %c0_3 = arith.constant 0 : index
    %1 = vector.load %arg2[%c0_2, %c0_3] : memref<5x32xf32, #tpu.memory_space<vmem>>, vector<5x32xf32>
    %2 = vector.extract_strided_slice %1 {offsets = [0, 0], sizes = [1, 32], strides = [1, 1]} : vector<5x32xf32> to vector<1x32xf32>
    %3 = vector.extract_strided_slice %1 {offsets = [1, 0], sizes = [1, 32], strides = [1, 1]} : vector<5x32xf32> to vector<1x32xf32>
    %4 = vector.shape_cast %3 : vector<1x32xf32> to vector<1x1x32xf32>
    %5 = vector.extract_strided_slice %1 {offsets = [2, 0], sizes = [1, 4], strides = [1, 1]} : vector<5x32xf32> to vector<1x4xf32>
    %6 = vector.shape_cast %5 : vector<1x4xf32> to vector<1x1x4xf32>
    %7 = vector.extract_strided_slice %1 {offsets = [3, 0], sizes = [1, 4], strides = [1, 1]} : vector<5x32xf32> to vector<1x4xf32>
    %8 = vector.shape_cast %7 : vector<1x4xf32> to vector<1x1x4xf32>
    %9 = vector.extract_strided_slice %1 {offsets = [4, 0], sizes = [1, 4], strides = [1, 1]} : vector<5x32xf32> to vector<1x4xf32>
    %10 = vector.shape_cast %9 : vector<1x4xf32> to vector<1x1x4xf32>
    %11 = vector.shape_cast %2 : vector<1x32xf32> to vector<1x1x32xf32>
    "tpu.trace_start"() <{level = 10 : i32, message = "boc,bcs->bos"}> : () -> ()
    %cst = arith.constant dense<0.000000e+00> : vector<1x1x256xf32>
    %12 = tpu.matmul %11, %0, %cst {dimension_numbers = #tpu.dot_dimension_numbers<[2], [1], [1], [2], [0, 0, 0, 1, 1, 2], [0], [0]>} : vector<1x1x32xf32>, vector<1x32x256xf32>, vector<1x1x256xf32> -> vector<1x1x256xf32>
    "tpu.trace_stop"() : () -> ()
    %cst_4 = arith.constant dense<0xFF800000> : vector<1x1xf32>
    %13 = vector.multi_reduction <maximumf>, %12, %cst_4 [2] : vector<1x1x256xf32> to vector<1x1xf32>
    %14 = vector.shape_cast %13 : vector<1x1xf32> to vector<1x1x1xf32>
    %15 = vector.broadcast %14 : vector<1x1x1xf32> to vector<1x1x256xf32>
    %16 = arith.subf %12, %15 : vector<1x1x256xf32>
    %17 = math.exp %16 : vector<1x1x256xf32>
    %cst_5 = arith.constant dense<0.000000e+00> : vector<1x1xf32>
    %18 = vector.multi_reduction <add>, %17, %cst_5 [2] : vector<1x1x256xf32> to vector<1x1xf32>
    %19 = vector.shape_cast %18 : vector<1x1xf32> to vector<1x1x1xf32>
    %cst_6 = arith.constant 1.000000e+00 : f32
    %20 = vector.broadcast %cst_6 : f32 to vector<1x1x1xf32>
    %21 = arith.divf %20, %19 : vector<1x1x1xf32>
    %22 = vector.broadcast %21 : vector<1x1x1xf32> to vector<1x1x256xf32>
    %23 = arith.mulf %17, %22 : vector<1x1x256xf32>
    "tpu.trace_start"() <{level = 10 : i32, message = "bos,bcs->boc"}> : () -> ()
    %cst_7 = arith.constant dense<0.000000e+00> : vector<1x1x32xf32>
    %24 = tpu.matmul %23, %0, %cst_7 {dimension_numbers = #tpu.dot_dimension_numbers<[2], [2], [1], [1], [0, 0, 0, 1, 1, 1], [0], [0]>} : vector<1x1x256xf32>, vector<1x32x256xf32>, vector<1x1x32xf32> -> vector<1x1x32xf32>
    "tpu.trace_stop"() : () -> ()
    %c0_8 = arith.constant 0 : index
    %c0_9 = arith.constant 0 : index
    %25 = vector.load %arg3[%c0_8, %c0_9] : memref<4x32xf32, #tpu.memory_space<vmem>>, vector<4x32xf32>
    %26 = vector.shape_cast %25 : vector<4x32xf32> to vector<1x4x32xf32>
    %c0_10 = arith.constant 0 : index
    %c0_11 = arith.constant 0 : index
    %27 = vector.load %arg4[%c0_10, %c0_11] : memref<32x4xf32, #tpu.memory_space<vmem>>, vector<32x4xf32>
    %28 = vector.shape_cast %27 : vector<32x4xf32> to vector<1x32x4xf32>
    "tpu.trace_start"() <{level = 10 : i32, message = "boc,brc->bor"}> : () -> ()
    %cst_12 = arith.constant dense<0.000000e+00> : vector<1x1x4xf32>
    %29 = tpu.matmul %24, %26, %cst_12 {dimension_numbers = #tpu.dot_dimension_numbers<[2], [2], [1], [1], [0, 0, 0, 1, 1, 1], [0], [0]>} : vector<1x1x32xf32>, vector<1x4x32xf32>, vector<1x1x4xf32> -> vector<1x1x4xf32>
    "tpu.trace_stop"() : () -> ()
    %30 = arith.addf %29, %6 : vector<1x1x4xf32>
    %cst_13 = arith.constant dense<0.000000e+00> : vector<1x1xf32>
    %31 = vector.multi_reduction <add>, %30, %cst_13 [2] : vector<1x1x4xf32> to vector<1x1xf32>
    %32 = vector.shape_cast %31 : vector<1x1xf32> to vector<1x1x1xf32>
    %cst_14 = arith.constant 4.000000e+00 : f32
    %33 = vector.broadcast %cst_14 : f32 to vector<1x1x1xf32>
    %34 = arith.divf %32, %33 : vector<1x1x1xf32>
    %35 = vector.broadcast %34 : vector<1x1x1xf32> to vector<1x1x4xf32>
    %36 = arith.subf %30, %35 : vector<1x1x4xf32>
    %37 = arith.mulf %36, %36 : vector<1x1x4xf32>
    %cst_15 = arith.constant dense<0.000000e+00> : vector<1x1xf32>
    %38 = vector.multi_reduction <add>, %37, %cst_15 [2] : vector<1x1x4xf32> to vector<1x1xf32>
    %39 = vector.shape_cast %38 : vector<1x1xf32> to vector<1x1x1xf32>
    %cst_16 = arith.constant 4.000000e+00 : f32
    %40 = vector.broadcast %cst_16 : f32 to vector<1x1x1xf32>
    %41 = arith.divf %39, %40 : vector<1x1x1xf32>
    %42 = vector.broadcast %34 : vector<1x1x1xf32> to vector<1x1x4xf32>
    %43 = arith.subf %30, %42 : vector<1x1x4xf32>
    %cst_17 = arith.constant 9.99999974E-6 : f32
    %44 = vector.broadcast %cst_17 : f32 to vector<1x1x1xf32>
    %45 = arith.addf %41, %44 : vector<1x1x1xf32>
    %46 = math.rsqrt %45 : vector<1x1x1xf32>
    %47 = vector.broadcast %46 : vector<1x1x1xf32> to vector<1x1x4xf32>
    %48 = arith.mulf %43, %47 : vector<1x1x4xf32>
    %49 = arith.mulf %48, %8 : vector<1x1x4xf32>
    %50 = arith.addf %49, %10 : vector<1x1x4xf32>
    %cst_18 = arith.constant 0.000000e+00 : f32
    %51 = vector.broadcast %cst_18 : f32 to vector<1x1x4xf32>
    %52 = arith.maximumf %50, %51 : vector<1x1x4xf32>
    "tpu.trace_start"() <{level = 10 : i32, message = "bor,bcr->boc"}> : () -> ()
    %cst_19 = arith.constant dense<0.000000e+00> : vector<1x1x32xf32>
    %53 = tpu.matmul %52, %28, %cst_19 {dimension_numbers = #tpu.dot_dimension_numbers<[2], [2], [1], [1], [0, 0, 0, 1, 1, 1], [0], [0]>} : vector<1x1x4xf32>, vector<1x32x4xf32>, vector<1x1x32xf32> -> vector<1x1x32xf32>
    "tpu.trace_stop"() : () -> ()
    %54 = arith.addf %53, %4 : vector<1x1x32xf32>
    %55 = tpu.transpose %54, [0, 2, 1] : vector<1x1x32xf32> -> vector<1x32x1xf32>
    %56 = vector.broadcast %55 : vector<1x32x1xf32> to vector<1x32x256xf32>
    %57 = arith.addf %0, %56 : vector<1x32x256xf32>
    %c0_20 = arith.constant 0 : index
    %c0_21 = arith.constant 0 : index
    %c0_22 = arith.constant 0 : index
    %58 = vector.load %arg5[%c0_20, %c0_21, %c0_22] : memref<1x32x256xf32, #tpu.memory_space<vmem>>, vector<1x32x256xf32>
    tpu.vector_store %arg5[%c0_20, %c0_21, %c0_22], %57 {strides = array<i32>} : memref<1x32x256xf32, #tpu.memory_space<vmem>>, vector<1x32x256xf32>,
    return
  }
  func.func @transform_0(%arg0: i32) -> (i32, i32, i32) {
    %c0_i32 = arith.constant 0 : i32
    %c0_i32_0 = arith.constant 0 : i32
    %c0_i32_1 = arith.constant 0 : i32
    return %arg0, %c0_i32, %c0_i32_0 : i32, i32, i32
  }
  func.func @transform_1(%arg0: i32) -> (i32, i32) {
    %c0_i32 = arith.constant 0 : i32
    %c0_i32_0 = arith.constant 0 : i32
    %c0_i32_1 = arith.constant 0 : i32
    return %c0_i32, %c0_i32_0 : i32, i32
  }
  func.func @transform_2(%arg0: i32) -> (i32, i32) {
    %c0_i32 = arith.constant 0 : i32
    %c0_i32_0 = arith.constant 0 : i32
    %c0_i32_1 = arith.constant 0 : i32
    return %c0_i32, %c0_i32_0 : i32, i32
  }
  func.func @transform_3(%arg0: i32) -> (i32, i32) {
    %c0_i32 = arith.constant 0 : i32
    %c0_i32_0 = arith.constant 0 : i32
    %c0_i32_1 = arith.constant 0 : i32
    return %c0_i32, %c0_i32_0 : i32, i32
  }
  func.func @transform_4(%arg0: i32) -> (i32, i32, i32) {
    %c0_i32 = arith.constant 0 : i32
    %c0_i32_0 = arith.constant 0 : i32
    %c0_i32_1 = arith.constant 0 : i32
    return %arg0, %c0_i32, %c0_i32_0 : i32, i32, i32
  }
}

</mosaic_0001>

<bundles_post_ra>
// kernel: wmsp_context_block.1
= control target key start
LH: loop header
LB: loop body
LE: loop exit
PB: predicated region body
PF: predicated region fallthrough
CT: control target
= control target key end

     0   :  { %s816_s15 = smov 0   ;;  %s911_s0 = inlined_call_operand.vmem [shape: f32[2,32,256], index: 0, kind: input, shape index: {}, may-alias: {0,4}]   ;;  %s912_s1 = inlined_call_operand.vmem [shape: f32[5,32], index: 1, kind: input, shape index: {}]   ;;  %s913_s2 = inlined_call_operand.vmem [shape: f32[4,32], index: 2, kind: input, shape index: {}]   ;;  %s914_s3 = inlined_call_operand.vmem [shape: f32[32,4], index: 3, kind: input, shape index: {}]   ;;  %s915_s4 = inlined_call_operand.vmem [shape: f32[2,32,256], index: 4, kind: output, shape index: {}, may-alias: {0,4}]  }
   0x1 LB: > { %s689_s16 = sadd.s32 4294967295, %s785_s15   ;;  %p693_p0 = scmp.ge.s32.totalorder %s785_s15, 1  ;;  %s785_s15 = sphi %s816_s15, %s14_s15  }
   0x2   : > { %p162_p1 = scmp.lt.s32.totalorder %s785_s15, 3 }
   0x4   : > { %p163_p2 = pnand %p693_p0, %p162_p1 }
   0x5   : > { %p188_p3 = scmp.lt.s32.totalorder (!%p163_p2), %s689_s16, 1  ;;  %v787_v0 = vmov (!%p163_p2), 0.0   ;;  %v861_v13 = vld [vmem:[%s912_s1] sm:$0x1f] (!%p163_p2)  ;;  %vm207_vm0 = vcmask (!%p163_p2), 261120   ;;  %vm282_vm1 = vcmask (!%p163_p2), 1040384  }
   0x6   : > { %166 = sbr.rel (%p163_p2) target bundleno = 1787 (0x6fb), region = 36  ;;  %275 = vmatprep.mubr.f32.mxu1 (!%p163_p2), %v787_v0  ;;  %717 = vmatprep.subr.mxu0 (!%p163_p2), %v787_v0  ;;  %v373_v29 = vld [vmem:[%s913_s2] sm:$0xf] (!%p163_p2)  ;;  %vm788_vm2 = vmmov (!%p163_p2), 0   ;;  %v378_v36 = vrot.slane (!%p163_p2), %v861_v13, 2  ;;  %vm456_vm3 = vcmask (!%p163_p2), 24576  }
   0x7   : > { %718 = vmatpush3.xpose.msk.msra.mxu0 (!%p163_p2), %vm207_vm0, %v373_v29  ;;  %719 = vmatprep.mubr.msk.f32.mxu0 (!%p163_p2), %vm788_vm2, %v787_v0  ;;  %v374_v46 = vld [vmem:[%s914_s3] sm:$0xff] (!%p163_p2)  ;;  %v375_v47 = vld [vmem:[%s914_s3 + $0x8] sm:$0xff] (!%p163_p2)  ;;  %vm480_vm4 = vcmask (!%p163_p2), 31744   ;;  %v789_v49 = vmov (!%p163_p2), 0.0|0.0   ;;  %v376_v50 = vld [vmem:[%s914_s3 + $0x10] sm:$0xff] (!%p163_p2)  ;;  %v471_v56 = vrot.slane (!%p163_p2), %v861_v13, 3 }
   0x8   : > { %v750_v48 = vpack.c.bf16 (!%p163_p2), %v375_v47, %v374_v46  ;;  %749 = vmatprep.subr.bf16.mxu0 (!%p163_p2), %v789_v49  ;;  %vm751_vm5 = vmpackc.low (!%p163_p2), %vm480_vm4, %vm480_vm4  ;;  %v377_v51 = vld [vmem:[%s914_s3 + $0x18] sm:$0xff] (!%p163_p2)  ;;  %v474_v58 = vrot.slane (!%p163_p2), %v861_v13, 4  ;;  %v790_v63 = vmov (!%p163_p2), 0  }
   0x9   : > { %v754_v52 = vpack.c.bf16 (!%p163_p2), %v377_v51, %v376_v50  ;;  %769 = vset.pattern.permute.xlu1 (!%p163_p2), %v790_v63 }
   0xd   : > { %s917_s16 = smov (!%p188_p3, %s689_s16), 1 }
   0xe   : > { %s708_s17 = sshll.u32 %s917_s16, 6 }
   0xf   : > { %s192_s20 = scalar_lea.vmem %s911_s0, %s708_s17  ;;  %s197_s9 = scalar_lea.vmem %s915_s4, %s708_s17 }
  0x10   : > { %v834_v1 = vld [vmem:[%s192_s20 + $0x8] sm:$0xff]  ;;  %v836_v2 = vld [vmem:[%s192_s20 + $0x18] sm:$0xff]  ;;  %v838_v3 = vld [vmem:[%s192_s20] sm:$0xff] }
  0x11   : > { %v733_v4 = vpack.c.bf16 %v836_v2, %v834_v1  ;;  %v842_v5 = vld [vmem:[%s192_s20 + $0x10] sm:$0xff]  ;;  %v844_v6 = vld [vmem:[%s192_s20 + $0x28] sm:$0xff]  ;;  %v846_v7 = vld [vmem:[%s192_s20 + $0x38] sm:$0xff] }
  0x12   : > { %v735_v8 = vpack.c.bf16 %v842_v5, %v838_v3  ;;  %v737_v9 = vpack.c.bf16 %v846_v7, %v844_v6  ;;  %v852_v10 = vld [vmem:[%s192_s20 + $0x20] sm:$0xff]  ;;  %v854_v11 = vld [vmem:[%s192_s20 + $0x30] sm:$0xff] }
  0x13   : > { %734 = vmatprep.subr.bf16.mxu1 %v733_v4  ;;  %v739_v12 = vpack.c.bf16 %v854_v11, %v852_v10 }
  0x14   : > { %736 = vmatpush1.bf16.msra.mxu1 %v735_v8 }
  0x15   : > { %738 = vmatprep.subr.bf16.mxu1 %v737_v9 }
  0x18   : > { %740 = vmatpush1.bf16.msra.mxu1 %v739_v12 }
  0x19   : > { %742 = vmatprep.subr.bf16.mxu1 %v733_v4 }
  0x1b   : > { %698 = vmatmul.mubr.msk.f32.vlgmr.msra.gmra.mrb[0].mxu1 %vm207_vm0, %v861_v13 }
  0x21   : > { %744 = vmatpush1.bf16.xpose.msra.mxu1 %v735_v8 }
  0x22   : > { %746 = vmatprep.subr.bf16.mxu1 %v737_v9 }
  0x29   : > { %748 = vmatpush1.bf16.xpose.msra.mxu1 %v739_v12 }
  0xee   : > { %v277_v14 = vpop.f32.mrb[0].mxu1 }
  0xef   : > { %v279_v15 = vpop.f32.mrb[1].mxu1  ;;  %v283_v16 = vsel %vm282_vm1, %v277_v14, -inf }
  0xf0   : > { %v284_v17 = vsel %vm282_vm1, %v279_v15, -inf }
  0xf1   : > { %v285_v18 = vmax.f32 %v283_v16, %v284_v17 }
  0xf3   : > { %286 = vmax.xlane.f32.xlu0 %v285_v18 }
 0x180   : > { %v287_v19 = vpop.xlane.xlu0 %286 }
 0x181   : > { %v288_v20 = vsub.f32 %v277_v14, %v287_v19  ;;  %v289_v21 = vsub.f32 %v279_v15, %v287_v19 }
 0x183   : > { %v290_v22 = vmul.f32 1.442695, %v288_v20  ;;  %v292_v23 = vmul.f32 1.442695, %v289_v21 }
 0x185   : > { %771 = vpow2.f32 %v290_v22 }
 0x186   : > { %773 = vpow2.f32 %v292_v23 }
 0x18f   : > { %v772_v24 = vpop.eup %771 }
 0x190   : > { %v774_v25 = vpop.eup %773  ;;  %v294_v26 = vsel %vm282_vm1, %v772_v24, 0.0 }
 0x191   : > { %v295_v27 = vsel %vm282_vm1, %v774_v25, 0.0 }
 0x192   : > { %v296_v28 = vadd.f32 %v295_v27, %v294_v26 }
 0x194   : > { %297 = vadd.xlane.f32.xlu0 %v296_v28 }
 0x221   : > { %v298_v30 = vpop.xlane.xlu0 %297 }
 0x222   : > { %775 = vrcp.f32 %v298_v30 }
 0x22c   : > { %v776_v31 = vpop.eup %775 }
 0x22d   : > { %v302_v32 = vmul.f32 %v776_v31, %v774_v25  ;;  %v301_v33 = vmul.f32 %v776_v31, %v772_v24 }
 0x22f   : > { %367 = vmatprep.mubr.f32.mxu1 %v302_v32 }
 0x230   : > { %368 = vmatmul.mubr.f32.vlgmr.msra.gmra.mrb[2].mxu1 %v301_v33 }
 0x303   : > { %v369_v34 = vpop.f32.mrb[2].mxu1 }
 0x304   : > { %v371_v35 = vpop.f32.mrb[3].mxu1  ;;  %720 = vmatmul.mubr.msk.f32.vlgmr.msra.gmra.mrb[0].mxu0 %vm207_vm0, %v369_v34 }
 0x305   : > { %730 = vmatprep.mubr.msk.f32.mxu0 %vm788_vm2, %v787_v0  ;;  %752 = vmatpush3.bf16.xpose.msk.msra.mxu0 %vm751_vm5, %v750_v48  ;;  %v478_v0 = vrot.slane %v861_v13, 1 }
 0x306   : > { %753 = vmatprep.subr.bf16.mxu0 %v789_v49 }
 0x30d   : > { %756 = vmatpush3.bf16.xpose.msk.msra.mxu0 %vm751_vm5, %v754_v52 }
 0x3d7   : > { %v452_v37 = vpop.f32.mrb[0].mxu0 }
 0x3d8   : > { %v453_v38 = vadd.f32 %v452_v37, %v378_v36  ;;  %v721_v39 = vpop.f32.mrb[1].mxu0 }
 0x3da   : > { %v457_v40 = vsel %vm456_vm3, %v453_v38, 0.0 }
 0x3db   : > { %458 = vadd.xlane.f32.xlu1 %v457_v40 }
 0x468   : > { %v459_v41 = vpop.xlane.xlu1 %458 }
 0x469   : > { %v461_v42 = vmul.f32 0.25, %v459_v41 }
 0x46b   : > { %v462_v43 = vsub.f32 %v453_v38, %v461_v42 }
 0x46d   : > { %v463_v44 = vmul.f32 %v462_v43, %v462_v43 }
 0x46f   : > { %v464_v45 = vsel %vm456_vm3, %v463_v44, 0.0 }
 0x470   : > { %465 = vadd.xlane.f32.xlu1 %v464_v45 }
 0x4fd   : > { %v466_v53 = vpop.xlane.xlu1 %465 }
 0x4fe   : > { %v467_v54 = vmul.f32 0.25, %v466_v53 }
 0x500   : > { %v468_v55 = vadd.f32 1e-05, %v467_v54 }
 0x502   : > { %777 = vrsqrt.f32 %v468_v55 }
 0x50c   : > { %v778_v57 = vpop.eup %777 }
 0x50d   : > { %v470_v59 = vmul.f32 %v778_v57, %v462_v43 }
 0x50f   : > { %v473_v60 = vmul.f32 %v471_v56, %v470_v59 }
 0x511   : > { %v476_v61 = vadd.f32 %v474_v58, %v473_v60 }
 0x513   : > { %v477_v62 = vmax.f32 %v476_v61, 0.0 }
 0x515   : > { %731 = vmatmul.mubr.msk.f32.vlgmr.msra.gmra.mrb[2].mxu0 %vm480_vm4, %v477_v62 }
 0x5e8   : > { %v562_v4 = vpop.f32.mrb[2].mxu0 }
 0x5e9   : > { %v563_v8 = vadd.f32 %v562_v4, %v478_v0  ;;  %v732_v9 = vpop.f32.mrb[3].mxu0 }
 0x5eb   : > { %566 = vxpose.xlu0.b32.start.end [1/1] (short) (narrow) %v563_v8, 32 }
 0x614   : > { %770 = vset.pattern.permute.xlu0 %v790_v63 }
 0x66b   : > { %v582_v12 = vpop.trf.xlu0 }
 0x66c   : > { %600 = vperm.xlu1 %769, %v582_v12  }
 0x66f   : > { %v583_v14 = vpop.trf.xlu0 }
 0x670   : > { %605 = vperm.xlu1 %769, %v583_v14  }
 0x673   : > { %v584_v15 = vpop.trf.xlu0 }
 0x674   : > { %610 = vperm.xlu1 %769, %v584_v15  }
 0x677   : > { %v585_v16 = vpop.trf.xlu0 }
 0x678   : > { %615 = vperm.xlu1 %769, %v585_v16  }
 0x6eb   : > { %v601_v17 = vpop.permute.xlu1 %600 }
 0x6ec   : > { %v618_v13 = vadd.f32 %v601_v17, %v838_v3  ;;  %v619_v18 = vadd.f32 %v601_v17, %v834_v1 }
 0x6ee   : > { %626 = vst [vmem:[%s197_s9] sm:$0xff] %v618_v13  ;;  %627 = vst [vmem:[%s197_s9 + $0x8] sm:$0xff] %v619_v18 }
 0x6ef   : > { %v606_v19 = vpop.permute.xlu1 %605 }
 0x6f0   : > { %v620_v20 = vadd.f32 %v606_v19, %v842_v5  ;;  %v621_v21 = vadd.f32 %v606_v19, %v836_v2 }
 0x6f2   : > { %628 = vst [vmem:[%s197_s9 + $0x10] sm:$0xff] %v620_v20  ;;  %629 = vst [vmem:[%s197_s9 + $0x18] sm:$0xff] %v621_v21 }
 0x6f3   : > { %v611_v22 = vpop.permute.xlu1 %610 }
 0x6f4   : > { %v622_v23 = vadd.f32 %v611_v22, %v852_v10  ;;  %v623_v24 = vadd.f32 %v611_v22, %v844_v6 }
 0x6f6   : > { %630 = vst [vmem:[%s197_s9 + $0x20] sm:$0xff] %v622_v23  ;;  %631 = vst [vmem:[%s197_s9 + $0x28] sm:$0xff] %v623_v24 }
 0x6f7   : > { %v616_v25 = vpop.permute.xlu1 %615 }
 0x6f8   : > { %v624_v3 = vadd.f32 %v616_v25, %v854_v11  ;;  %v625_v1 = vadd.f32 %v616_v25, %v846_v7 }
 0x6fa   : > { %632 = vst [vmem:[%s197_s9 + $0x30] sm:$0xff] %v624_v3  ;;  %633 = vst [vmem:[%s197_s9 + $0x38] sm:$0xff] %v625_v1 }
 0x6fb PF: > { %s14_s15 = sadd.s32 1, %s785_s15  }
 0x6fc   : > { %p11_p4 = scmp.ge.s32.totalorder %s14_s15, 4  }
 0x6fe   :  { %13 = sbr.rel (!%p11_p4) target bundleno = 1 (0x1), region = 66 }

</bundles_post_ra>
